<compile_context>
chip_gen: v5e
topology: v5e:2x2
jax: 0.10.0
libtpu: 0.0.40
codegen_flags: <defaults>
</compile_context>

<pallas_src>
import functools

import jax
import jax.numpy as jnp
from jax.experimental import pallas as pl
from jax.experimental.pallas import tpu as pltpu


def _round_up(x: int, m: int) -> int:
    return ((x + m - 1) // m) * m


def _pick_batch_tile(batch: int, feat_dim: int, feat_itemsize: int,
                     centers_bytes: int) -> int:
    """Byte-targeted batch tile: ~2 MiB of feature payload per buffer, multiple of 8,
    >=2 tiles when the batch allows it, and capped for v5e's small scoped VMEM."""
    target_bytes = 2 * 1024 * 1024
    tb = target_bytes // max(1, feat_dim * feat_itemsize)
    tb = min(tb, 2048)
    if batch >= 16:                      # keep >=2 grid tiles -> megacore on v7x
        tb = min(tb, pl.cdiv(batch, 2))
    tb = min(tb, batch)
    # VMEM budget: 2x feature buffers + 2x lane-padded label buffers + single-buffered
    # centers + 2x (8, D) output buffers must fit comfortably in v5e's 16 MiB default.
    budget = 12 * 1024 * 1024
    per_row = 2 * feat_dim * feat_itemsize + 2 * 128 * 4
    avail = budget - centers_bytes - 2 * 8 * feat_dim * 4
    if avail > 0:
        tb = min(tb, avail // per_row)
    return max(8, _round_up(tb, 8))


def _center_loss_kernel(batch, lbl_ref, feat_ref, cent_ref, out_ref):
    """One grid step handles TB batch rows.

    lbl_ref  : VMEM (TB, 1) int32   labels for this batch tile
    feat_ref : VMEM (TB, D)         feature rows for this tile (storage dtype)
    cent_ref : VMEM (C, D)          full centers table (resident, single-buffered)
    out_ref  : VMEM (1, 8, D) f32   lane-dense per-tile partial sums
    """
    i = pl.program_id(0)
    tb, d = feat_ref.shape
    c = cent_ref.shape[0]

    labels = lbl_ref[...]                                             # (TB, 1) int32

    # In-kernel gather of centers[labels] as an exact f32 one-hot matmul on the MXU.
    # (Out-of-range labels would give an all-zero one-hot row; labels are trusted here.)
    class_ids = jax.lax.broadcasted_iota(jnp.int32, (tb, c), 1)       # (TB, C)
    onehot = (labels == class_ids).astype(jnp.float32)                # (TB, C)
    centers_rows = jnp.dot(onehot, cent_ref[...].astype(jnp.float32),
                           preferred_element_type=jnp.float32)        # (TB, D)

    # Row mask for the (possibly partial) last tile.  Mask BEFORE squaring so that
    # NaN/Inf garbage in the out-of-bounds tail cannot poison the reduction.
    row_ids = i * tb + jax.lax.broadcasted_iota(jnp.int32, (tb, 1), 0)
    diff = jnp.where(row_ids < batch,
                     feat_ref[...].astype(jnp.float32) - centers_rows,
                     0.0)                                             # (TB, D)

    sq = diff * diff
    # Lane-dense VALU partial sum: fold the TB/8 sublane groups into one (8, D) slab.
    out_ref[...] = jnp.sum(sq.reshape(1, tb // 8, 8, d), axis=1)      # (1, 8, D)


def center_loss(features: jax.Array, labels: jax.Array, centers: jax.Array,
                *, tile_b: int | None = None) -> jax.Array:
    """Pallas equivalent of:  F.mse_loss(features, centers[labels])  (mean reduction)."""
    B, D = features.shape
    C, Dc = centers.shape
    assert D == Dc, "feature dim mismatch"

    if tile_b is None:
        tb = _pick_batch_tile(B, D, features.dtype.itemsize,
                              C * D * centers.dtype.itemsize)
    else:
        tb = max(8, _round_up(min(tile_b, _round_up(B, 8)), 8))
    num_tiles = pl.cdiv(B, tb)

    # Labels as a (B, 1) int32 column; (tb, 1) blocks are sublane-aligned (tb % 8 == 0).
    lbl2 = labels.astype(jnp.int32).reshape(B, 1)

    kernel = functools.partial(_center_loss_kernel, B)

    partials = pl.pallas_call(
        kernel,
        out_shape=jax.ShapeDtypeStruct((num_tiles, 8, D), jnp.float32),
        grid=(num_tiles,),
        in_specs=[
            pl.BlockSpec((tb, 1), lambda i: (i, 0)),        # labels tile
            pl.BlockSpec((tb, D), lambda i: (i, 0)),        # features tile
            pl.BlockSpec((C, D), lambda i: (0, 0),          # resident centers table
                         pipeline_mode=pl.Buffered(buffer_count=1)),
        ],
        out_specs=pl.BlockSpec((1, 8, D), lambda i: (i, 0, 0)),
        compiler_params=pltpu.CompilerParams(
            dimension_semantics=("parallel",),              # independent tiles -> megacore OK
            vmem_limit_bytes=32 * 1024 * 1024,
        ),
    )(lbl2, features, centers)

    # Tiny final cross-lane reduction + mean normalization in the XLA graph.
    return jnp.sum(partials) / (B * D)


if __name__ == "__main__":
    # Deterministic setup (mirrors CenterLoss.__init__ which uses randn centers).
    num_classes = 10
    feat_dim = 128
    batch = 300          # not a multiple of the tile -> exercises the partial-tile mask

    key = jax.random.PRNGKey(0)
    k_centers, k_feat, k_lbl = jax.random.split(key, 3)

    centers = jax.random.normal(k_centers, (num_classes, feat_dim), dtype=jnp.float32)
    features = jax.random.normal(k_feat, (batch, feat_dim), dtype=jnp.float32)
    labels = jax.random.randint(k_lbl, (batch,), 0, num_classes, dtype=jnp.int32)

    # Pure-JAX reference (same semantics as F.mse_loss with 'mean' reduction).
    ref = jnp.mean((features - centers[labels]) ** 2)

    # Auto-tiled path (byte-targeted tile, >=2 tiles, last tile partial).
    loss_auto = jax.block_until_ready(center_loss(features, labels, centers))
    assert jnp.allclose(loss_auto, ref, rtol=1e-5, atol=1e-6), (loss_auto, ref)

    # Explicit small tile path (5 tiles, last tile heavily masked).
    loss_small = jax.block_until_ready(center_loss(features, labels, centers, tile_b=64))
    assert jnp.allclose(loss_small, ref, rtol=1e-5, atol=1e-6), (loss_small, ref)

    print("KERNEL_OK")
</pallas_src>

<mosaic_0001>
module attributes {stable_mosaic.version = 11 : i64} {
  func.func @_center_loss_kernel(%arg0: i32, %arg1: memref<152x1xi32, #tpu.memory_space<vmem>>, %arg2: memref<152x128xf32, #tpu.memory_space<vmem>>, %arg3: memref<10x128xf32, #tpu.memory_space<vmem>>, %arg4: memref<1x8x128xf32, #tpu.memory_space<vmem>>) attributes {dimension_semantics = [#tpu.dimension_semantics<parallel>], iteration_bounds = array<i64: 2>, scalar_prefetch = 0 : i64, scratch_operands = 0 : i64, tpu.core_type = #tpu.core_type<tc>, window_params = [{transform_indices = @transform_0, window_bounds = array<i64: 152, 1>}, {transform_indices = @transform_1, window_bounds = array<i64: 152, 128>}, {pipeline_mode = #tpu.pipeline_mode<synchronous>, transform_indices = @transform_2, window_bounds = array<i64: 10, 128>}, {transform_indices = @transform_3, window_bounds = array<i64: 1, 8, 128>}]} {
    %c0 = arith.constant 0 : index
    %c0_0 = arith.constant 0 : index
    %0 = vector.load %arg1[%c0, %c0_0] : memref<152x1xi32, #tpu.memory_space<vmem>>, vector<152x1xi32>
    %1 = tpu.iota {dimensions = array<i32: 1>} : vector<152x10xi32>
    %2 = vector.broadcast %0 : vector<152x1xi32> to vector<152x10xi32>
    %3 = arith.cmpi eq, %2, %1 : vector<152x10xi32>
    %4 = arith.extui %3 : vector<152x10xi1> to vector<152x10xi32>
    %5 = arith.sitofp %4 : vector<152x10xi32> to vector<152x10xf32>
    %c0_1 = arith.constant 0 : index
    %c0_2 = arith.constant 0 : index
    %6 = vector.load %arg3[%c0_1, %c0_2] : memref<10x128xf32, #tpu.memory_space<vmem>>, vector<10x128xf32>
    %cst = arith.constant dense<0.000000e+00> : vector<152x128xf32>
    %7 = tpu.matmul %5, %6, %cst {dimension_numbers = #tpu.dot_dimension_numbers<[1], [0], [0], [1], [0, 0, 1, 1], [], []>} : vector<152x10xf32>, vector<10x128xf32>, vector<152x128xf32> -> vector<152x128xf32>
    %c152_i32 = arith.constant 152 : i32
    %8 = arith.muli %arg0, %c152_i32 : i32
    %9 = tpu.iota {dimensions = array<i32: 0>} : vector<152x1xi32>
    %10 = vector.broadcast %8 : i32 to vector<152x1xi32>
    %11 = arith.addi %10, %9 : vector<152x1xi32>
    %c300_i32 = arith.constant 300 : i32
    %12 = vector.broadcast %c300_i32 : i32 to vector<152x1xi32>
    %13 = arith.cmpi slt, %11, %12 : vector<152x1xi32>
    %c0_3 = arith.constant 0 : index
    %c0_4 = arith.constant 0 : index
    %14 = vector.load %arg2[%c0_3, %c0_4] : memref<152x128xf32, #tpu.memory_space<vmem>>, vector<152x128xf32>
    %15 = arith.subf %14, %7 : vector<152x128xf32>
    %cst_5 = arith.constant 0.000000e+00 : f32
    %16 = vector.shape_cast %13 : vector<152x1xi1> to vector<152x1xi1>
    %17 = vector.broadcast %16 : vector<152x1xi1> to vector<152x128xi1>
    %18 = vector.broadcast %cst_5 : f32 to vector<152x128xf32>
    %19 = arith.select %17, %15, %18 : vector<152x128xi1>, vector<152x128xf32>
    %20 = arith.mulf %19, %19 : vector<152x128xf32>
    %21 = vector.shape_cast %20 : vector<152x128xf32> to vector<1x19x8x128xf32>
    %cst_6 = arith.constant dense<0.000000e+00> : vector<1x8x128xf32>
    %22 = vector.multi_reduction <add>, %21, %cst_6 [1] : vector<1x19x8x128xf32> to vector<1x8x128xf32>
    %c0_7 = arith.constant 0 : index
    %c0_8 = arith.constant 0 : index
    %c0_9 = arith.constant 0 : index
    %23 = vector.load %arg4[%c0_7, %c0_8, %c0_9] : memref<1x8x128xf32, #tpu.memory_space<vmem>>, vector<1x8x128xf32>
    tpu.vector_store %arg4[%c0_7, %c0_8, %c0_9], %22 {strides = array<i32>} : memref<1x8x128xf32, #tpu.memory_space<vmem>>, vector<1x8x128xf32>,
    return
  }
  func.func @transform_0(%arg0: i32) -> (i32, i32) {
    %c0_i32 = arith.constant 0 : i32
    %c0_i32_0 = arith.constant 0 : i32
    return %arg0, %c0_i32 : i32, i32
  }
  func.func @transform_1(%arg0: i32) -> (i32, i32) {
    %c0_i32 = arith.constant 0 : i32
    %c0_i32_0 = arith.constant 0 : i32
    return %arg0, %c0_i32 : i32, i32
  }
  func.func @transform_2(%arg0: i32) -> (i32, i32) {
    %c0_i32 = arith.constant 0 : i32
    %c0_i32_0 = arith.constant 0 : i32
    %c0_i32_1 = arith.constant 0 : i32
    return %c0_i32, %c0_i32_0 : i32, i32
  }
  func.func @transform_3(%arg0: i32) -> (i32, i32, i32) {
    %c0_i32 = arith.constant 0 : i32
    %c0_i32_0 = arith.constant 0 : i32
    %c0_i32_1 = arith.constant 0 : i32
    return %arg0, %c0_i32, %c0_i32_0 : i32, i32, i32
  }
}

</mosaic_0001>

<bundles_post_ra>
// kernel: tpu_custom_call.1
= control target key start
LH: loop header
LB: loop body
LE: loop exit
PB: predicated region body
PF: predicated region fallthrough
CT: control target
= control target key end

     0   :  { %8 = vsyncpa [#allocation3], 0  ;;  %s1286_s0 = inlined_call_operand.vmem [shape: s32[300,1], index: 0, kind: input, shape index: {}]   ;;  %s1287_s1 = inlined_call_operand.vmem [shape: f32[300,128], index: 1, kind: input, shape index: {}]   ;;  %s1288_s2 = inlined_call_operand.hbm [shape: f32[10,128], index: 2, kind: input, shape index: {}]   ;;  %s1289_s3 = inlined_call_operand.hbm [shape: f32[2,8,128], index: 3, kind: output, shape index: {}]  }
   0x1   :  { %9 = vsyncpa [#allocation4], 0 }
   0x2   :  { %11 = vsyncpa [#allocation4 + $0x1], 0  ;;  %s1013_s12 = smov 0   ;;  %s1015_s13 = smov 0  }
   0x3   :  { %s1017_s14 = smov 0   ;;  %s1019_s15 = smov 0  }
   0x4 LB: > { %s1034_s16 = sadd.s32 4294967295, %s986_s15   ;;  %s775_s17 = sadd.s32 4294967294, %s986_s15   ;;  %s986_s15 = sphi %s1019_s15, %s1295_s15   ;;  %s982_s14 = sphi %s1017_s14, %s1294_s14   ;;  %s978_s13 = sphi %s1015_s13, %s1293_s13   ;;  %s974_s12 = sphi %s1013_s12, %s1292_s12  }
   0x5   : > { %s1038_s18 = sadd.s32 1, %s986_s15   ;;  %s97_s19 = sadd.s32 1, %s982_s14 }
   0x6   : > { %s94_s20 = ssub.s32 %s986_s15, %s1038_s18  ;;  %p107_p0 = scmp.ne.s32.totalorder %s982_s14, %s978_s13 }
   0x7   : > { %p95_p1 = scmp.eq.s32.totalorder %s94_s20, 0  ;;  %p108_p2 = scmp.eq.s32.totalorder %s1034_s16, 1 }
   0x8   : > { %p113_p3 = scmp.ne.s32.totalorder %s978_s13, %s974_s12  ;;  %p114_p4 = scmp.eq.s32.totalorder %s775_s17, 1 }
   0x9   : > { %s1049_s21 = scalar_select %p95_p1, %s982_s14, %s97_s19  }
   0xa   : > { %p1051_p5 = por %p108_p2, %p107_p0  ;;  %p1055_p6 = por %p114_p4, %p113_p3 }
   0xb   : > { %p776_p7 = scmp.ge.s32.totalorder %s986_s15, 1  ;;  %p121_p8 = scmp.lt.s32.totalorder %s986_s15, 3 }
   0xc   : > { %p847_p9 = scmp.eq.s32.totalorder %s1034_s16, 0  ;;  %s132_s26 = sshll.u32 %s1288_s2, 4  ;;  %s133_s26 = int_to_ptr.hbm [resolvable:$true] %s132_s26 }
   0xd   : > { %p122_p10 = pnand %p776_p7, %p121_p8  ;;  %s988_s27 = smov [#allocation2]  }
   0xe   : > { %s134_s28 = sshll.u32 %s988_s27, 4  ;;  %s989_s29 = smov 128   ;;  %s135_s28 = int_to_ptr.vmem [resolvable:$true] %s134_s28 }
   0xf   : > { %p839_p11 = pneg %p122_p10  ;;  %s990_s30 = smov 8  }
  0x10   : > { %168 = sbr.rel (%p122_p10) target bundleno = 344 (0x158), region = 32 }
  0x11   : > { %p840_p12 = pnand %p847_p9, %p839_p11 }
  0x13   : > { %842 = dma.hbm_to_vmem [thread:$0]  (!%p840_p12), %s133_s26, 256, %s135_s28, [#allocation3], %s989_s29, %s989_s29, %s990_s30  }
  0x15   : > { %965 = dma.done.wait (%p847_p9), [#allocation3], 256  }
  0x16   : > { %967 = vsyncadd (%p847_p9), [#allocation3], 4294967040  ;;  %s198_s4 = smul.u32 19, %s1034_s16  ;;  %v991_v0 = vmov 0   ;;  %v346_v20 = vld [vmem:[#allocation2 + $0x8] sm:$0x3]  ;;  %v229_v23 = vlaneseq }
  0x17   : > { %889 = vset.pattern.permute.xlu2 %v991_v0  ;;  %888 = vset.pattern.permute.xlu1 %v991_v0  ;;  %vm405_vm0 = vcmask 1041408   ;;  %v345_v21 = vld [vmem:[#allocation2] sm:$0xff]  ;;  %vm347_vm1 = vcmask 80896   ;;  %v992_v28 = vmov 0.0   ;;  %s483_s9 = smul.u32 152, %s1034_s16  ;;  %s195_s19 = sand.u32 1, %s978_s13  }
  0x18   : > { %887 = vset.pattern.permute.xlu0 %v991_v0  ;;  %p199_p13 = scmp.lt.s32.totalorder %s198_s4, 37  ;;  %803 = vmatpush.msk.msra.mxu0 %vm405_vm0, %v346_v20  ;;  %v1102_v25 = vand.u32 127, %v229_v23  ;;  %s781_s20 = sshll.u32 %s195_s19, 3 }
  0x19   : > { %827 = vmatpush.msk.msra.mxu1 %vm405_vm0, %v346_v20  ;;  %828 = vmatpush.msk.msra.mxu2 %vm405_vm0, %v346_v20  ;;  %s824_s24 = sshll.u32 %s1034_s16, 3  ;;  %s197_s28 = scalar_lea.vmem [#allocation5], %s781_s20 }
  0x1a   : > { %s1297_s4 = smov (!%p199_p13, %s198_s4), 37  ;;  %829 = vmatpush.msk.msra.mxu3 %vm405_vm0, %v346_v20  ;;  %424 = vmatpush.msra.mxu0 %v345_v21  ;;  %s687_s27 = scalar_lea.hbm %s1289_s3, %s824_s24 }
  0x1b   : > { %s782_s5 = sshll.u32 %s1297_s4, 3  ;;  %830 = vmatpush.msra.mxu1 %v345_v21  ;;  %831 = vmatpush.msra.mxu2 %v345_v21  ;;  %s689_s29 = sshll.u32 %s197_s28, 4  ;;  %s690_s29 = int_to_ptr.vmem [resolvable:$true] %s689_s29 }
  0x1c   : > { %s1080_s8 = scalar_lea.vmem %s1286_s0, %s782_s5  ;;  %832 = vmatpush.msra.mxu3 %v345_v21  ;;  %s1178_s17 = scalar_lea.vmem %s1287_s1, %s782_s5 }
  0x1d   : > { %v215_v1 = vld [vmem:[%s1080_s8 + $0x28] sm:$0xff]  ;;  %v212_v2 = vld [vmem:[%s1080_s8 + $0x10] sm:$0xff]  ;;  %v210_v3 = vld [vmem:[%s1080_s8] sm:$0xff]  ;;  %s691_s30 = sshll.u32 %s687_s27, 4  ;;  %s677_s16 = scalar_lea.sflag [#allocation4], %s195_s19  ;;  %s692_s30 = int_to_ptr.hbm [resolvable:$true] %s691_s30 }
  0x1e   : > { %247 = vperm.xlu1 %888, %v215_v1   ;;  %238 = vperm.xlu2 %889, %v212_v2   ;;  %v220_v4 = vld [vmem:[%s1080_s8 + $0x50] sm:$0xff]  ;;  %v211_v6 = vld [vmem:[%s1080_s8 + $0x8] sm:$0xff]  ;;  %v213_v7 = vld [vmem:[%s1080_s8 + $0x18] sm:$0xff]  ;;  %v1164_v2 = vshrl.u32 %v229_v23, 7  ;;  %s934_s4 = sshra.s32 %s692_s30, 4  ;;  %s935_s4 = int_to_ptr.hbm [resolvable:$true] %s934_s4 }
  0x1f   : > { %232 = vperm.xlu0 %887, %v210_v3   ;;  %v216_v5 = vld [vmem:[%s1080_s8 + $0x30] sm:$0xff]  ;;  %v217_v8 = vld [vmem:[%s1080_s8 + $0x38] sm:$0xff]  ;;  %v214_v11 = vld [vmem:[%s1080_s8 + $0x20] sm:$0xff]  ;;  %s936_s5 = scalar_lea.hbm %s935_s4, 8  ;;  %p941_p3 = scmp.lt.s32.totalorder %s935_s4, %s1289_s3 }
  0x20   : > { %v221_v9 = vld [vmem:[%s1080_s8 + $0x58] sm:$0xff]  ;;  %v222_v12 = vld [vmem:[%s1080_s8 + $0x60] sm:$0xff]  ;;  %v223_v13 = vld [vmem:[%s1080_s8 + $0x68] sm:$0xff]  ;;  %v490_v21 = vadd.s32 40, %v1164_v2  ;;  %p937_p0 = scmp.ne.s32.totalorder %s935_s4, %s936_s5 }
  0x21   : > { %v225_v10 = vld [vmem:[%s1080_s8 + $0x78] sm:$0xff]  ;;  %v226_v14 = vld [vmem:[%s1080_s8 + $0x80] sm:$0xff]  ;;  %v224_v16 = vld [vmem:[%s1080_s8 + $0x70] sm:$0xff] }
  0x22   : > { %v218_v15 = vld [vmem:[%s1080_s8 + $0x40] sm:$0xff]  ;;  %v227_v17 = vld [vmem:[%s1080_s8 + $0x88] sm:$0xff]  ;;  %v228_v19 = vld [vmem:[%s1080_s8 + $0x90] sm:$0xff]  ;;  %p938_p1 = pnand %p937_p0, %p1051_p5 }
  0x23   : > { %v219_v18 = vld [vmem:[%s1080_s8 + $0x48] sm:$0xff]  ;;  %s940_s8 = scalar_lea.hbm %s1289_s3, 16 }
  0x24   : > { %p939_p2 = pneg %p938_p1  ;;  %p942_p4 = scmp.lt.s32.totalorder %s940_s8, %s936_s5 }
  0x26   : > { %262 = vperm.xlu1 %888, %v220_v4   ;;  %250 = vperm.xlu2 %889, %v216_v5   ;;  %v486_v4 = vadd.s32 8, %v1164_v2  ;;  %p943_p7 = por %p942_p4, %p941_p3 }
  0x27   : > { %235 = vperm.xlu0 %887, %v211_v6  }
  0x28   : > { %p944_p8 = pnand %p943_p7, %p939_p2 }
  0x2e   : > { %241 = vperm.xlu1 %888, %v213_v7   ;;  %253 = vperm.xlu2 %889, %v217_v8   ;;  %v487_v7 = vadd.s32 16, %v1164_v2  ;;  %v1180_v8 = vstv %s483_s9 }
  0x2f   : > { %265 = vperm.xlu0 %887, %v221_v9   ;;  %v506_v9 = vadd.s32 %v1180_v8, %v486_v4 }
  0x36   : > { %277 = vperm.xlu1 %888, %v225_v10   ;;  %244 = vperm.xlu2 %889, %v214_v11   ;;  %v544_v10 = vld [vmem:[%s1178_s17 + $0x8] sm:$0xff]  ;;  %v488_v11 = vadd.s32 24, %v1164_v2 }
  0x37   : > { %268 = vperm.xlu0 %887, %v222_v12   ;;  %v505_v12 = vadd.s32 %v1180_v8, %v1164_v2 }
  0x3e   : > { %271 = vperm.xlu1 %888, %v223_v13   ;;  %280 = vperm.xlu2 %889, %v226_v14   ;;  %v543_v13 = vld [vmem:[%s1178_s17] sm:$0xff]  ;;  %v507_v14 = vadd.s32 %v1180_v8, %v487_v7 }
  0x3f   : > { %256 = vperm.xlu0 %887, %v218_v15   ;;  %v545_v15 = vld [vmem:[%s1178_s17 + $0x10] sm:$0xff] }
  0x46   : > { %274 = vperm.xlu1 %888, %v224_v16   ;;  %283 = vperm.xlu2 %889, %v227_v17  }
  0x47   : > { %259 = vperm.xlu0 %887, %v219_v18   ;;  %v508_v18 = vadd.s32 %v1180_v8, %v488_v11  ;;  %v497_v11 = vadd.s32 96, %v1164_v2 }
  0x4f   : > { %286 = vperm.xlu0 %887, %v228_v19   ;;  %v546_v19 = vld [vmem:[%s1178_s17 + $0x18] sm:$0xff] }
  0x78   : > { %v239_v22 = vpop.permute.xlu2 %238 }
  0x79   : > { %vm290_vm8 = vcmp.eq.s32.totalorder %v239_v22, %v1102_v25 }
  0x7a   : > { %v786_v41 = vsel %vm290_vm8, 1.0, %v992_v28  ;;  %vm527_vm8 = vcmp.lt.s32.totalorder %v508_v18, 300 }
  0x80   : > { %v251_v24 = vpop.permute.xlu2 %250 }
  0x81   : > { %vm294_vm4 = vcmp.eq.s32.totalorder %v251_v24, %v1102_v25 }
  0x82   : > { %v790_v34 = vsel %vm294_vm4, 1.0, %v992_v28 }
  0x88   : > { %v254_v31 = vpop.permute.xlu2 %253 }
  0x89   : > { %vm295_vm7 = vcmp.eq.s32.totalorder %v254_v31, %v1102_v25 }
  0x8a   : > { %v791_v40 = vsel %vm295_vm7, 1.0, %v992_v28  ;;  %vm526_vm7 = vcmp.lt.s32.totalorder %v507_v14, 300 }
  0x90   : > { %v248_v26 = vpop.permute.xlu1 %247  ;;  %v245_v37 = vpop.permute.xlu2 %244 }
  0x91   : > { %vm293_vm2 = vcmp.eq.s32.totalorder %v248_v26, %v1102_v25  ;;  %v233_v27 = vpop.permute.xlu0 %232  ;;  %vm292_vm14 = vcmp.eq.s32.totalorder %v245_v37, %v1102_v25 }
  0x92   : > { %v789_v29 = vsel %vm293_vm2, 1.0, %v992_v28  ;;  %vm288_vm3 = vcmp.eq.s32.totalorder %v233_v27, %v1102_v25  ;;  %v788_v53 = vsel %vm292_vm14, 1.0, %v992_v28 }
  0x93   : > { %v784_v30 = vsel %vm288_vm3, 1.0, %v992_v28  ;;  %809 = vmatmul.msk.f32.vlgmr.msra.gmra.mxu1 %vm347_vm1, %v789_v29 }
  0x94   : > { %804 = vmatmul.msk.f32.vlgmr.msra.gmra.mxu0 %vm347_vm1, %v784_v30  ;;  %v510_v30 = vadd.s32 %v1180_v8, %v490_v21  ;;  %v498_v21 = vadd.s32 104, %v1164_v2 }
  0x98   : > { %v263_v32 = vpop.permute.xlu1 %262  ;;  %v281_v45 = vpop.permute.xlu2 %280 }
  0x99   : > { %vm298_vm5 = vcmp.eq.s32.totalorder %v263_v32, %v1102_v25  ;;  %v236_v33 = vpop.permute.xlu0 %235  ;;  %vm304_vm13 = vcmp.eq.s32.totalorder %v281_v45, %v1102_v25  ;;  %v492_v32 = vadd.s32 56, %v1164_v2 }
  0x9a   : > { %v794_v35 = vsel %vm298_vm5, 1.0, %v992_v28  ;;  %vm289_vm6 = vcmp.eq.s32.totalorder %v236_v33, %v1102_v25  ;;  %v800_v51 = vsel %vm304_vm13, 1.0, %v992_v28  ;;  %v548_v33 = vld [vmem:[%s1178_s17 + $0x28] sm:$0xff] }
  0x9b   : > { %v785_v36 = vsel %vm289_vm6, 1.0, %v992_v28  ;;  %810 = vmatmul.msk.f32.gmra.mxu1 %vm347_vm1, %v790_v34  ;;  %814 = vmatmul.msk.f32.vlgmr.msra.gmra.mxu2 %vm347_vm1, %v794_v35  ;;  %vm524_vm6 = vcmp.lt.s32.totalorder %v505_v12, 300 }
  0x9c   : > { %805 = vmatmul.msk.f32.gmra.mxu0 %vm347_vm1, %v785_v36 }
  0xa0   : > { %v242_v38 = vpop.permute.xlu1 %241  ;;  %v284_v55 = vpop.permute.xlu2 %283 }
  0xa1   : > { %v266_v39 = vpop.permute.xlu0 %265  ;;  %vm291_vm10 = vcmp.eq.s32.totalorder %v242_v38, %v1102_v25  ;;  %vm305_vm2 = vcmp.eq.s32.totalorder %v284_v55, %v1102_v25 }
  0xa2   : > { %vm299_vm9 = vcmp.eq.s32.totalorder %v266_v39, %v1102_v25  ;;  %v787_v47 = vsel %vm291_vm10, 1.0, %v992_v28  ;;  %v801_v58 = vsel %vm305_vm2, 1.0, %v992_v28 }
  0xa3   : > { %v795_v42 = vsel %vm299_vm9, 1.0, %v992_v28  ;;  %811 = vmatmul.msk.f32.gmra.mxu1 %vm347_vm1, %v791_v40  ;;  %v549_v40 = vld [vmem:[%s1178_s17 + $0x30] sm:$0xff]  ;;  %vm529_vm9 = vcmp.lt.s32.totalorder %v510_v30, 300  ;;  %v499_v30 = vadd.s32 112, %v1164_v2 }
  0xa4   : > { %806 = vmatmul.msk.f32.gmra.mxu0 %vm347_vm1, %v786_v41  ;;  %815 = vmatmul.msk.f32.gmra.mxu2 %vm347_vm1, %v795_v42 }
  0xa8   : > { %v278_v43 = vpop.permute.xlu1 %277 }
  0xa9   : > { %vm303_vm11 = vcmp.eq.s32.totalorder %v278_v43, %v1102_v25  ;;  %v269_v44 = vpop.permute.xlu0 %268  ;;  %v547_v43 = vld [vmem:[%s1178_s17 + $0x20] sm:$0xff] }
  0xaa   : > { %v799_v46 = vsel %vm303_vm11, 1.0, %v992_v28  ;;  %vm300_vm12 = vcmp.eq.s32.totalorder %v269_v44, %v1102_v25  ;;  %v493_v44 = vadd.s32 64, %v1164_v2 }
  0xab   : > { %v796_v48 = vsel %vm300_vm12, 1.0, %v992_v28  ;;  %819 = vmatmul.msk.f32.vlgmr.msra.gmra.mxu3 %vm347_vm1, %v799_v46  ;;  %v512_v46 = vadd.s32 %v1180_v8, %v492_v32  ;;  %v500_v32 = vadd.s32 120, %v1164_v2 }
  0xac   : > { %807 = vmatmul.msk.f32.gmra.mxu0 %vm347_vm1, %v787_v47  ;;  %816 = vmatmul.msk.f32.gmra.mxu2 %vm347_vm1, %v796_v48  ;;  %v550_v48 = vld [vmem:[%s1178_s17 + $0x38] sm:$0xff] }
  0xad   : > { %vm531_vm12 = vcmp.lt.s32.totalorder %v512_v46, 300 }
  0xb0   : > { %v272_v49 = vpop.permute.xlu1 %271 }
  0xb1   : > { %vm301_vm15 = vcmp.eq.s32.totalorder %v272_v49, %v1102_v25  ;;  %v257_v50 = vpop.permute.xlu0 %256 }
  0xb2   : > { %v797_v52 = vsel %vm301_vm15, 1.0, %v992_v28  ;;  %vm296_vm0 = vcmp.eq.s32.totalorder %v257_v50, %v1102_v25 }
  0xb3   : > { %v792_v54 = vsel %vm296_vm0, 1.0, %v992_v28  ;;  %820 = vmatmul.msk.f32.gmra.mxu3 %vm347_vm1, %v800_v51 }
  0xb4   : > { %808 = vmatmul.msk.f32.gmra.mxu0 %vm347_vm1, %v788_v53  ;;  %812 = vmatmul.msk.f32.gmra.mxu1 %vm347_vm1, %v792_v54  ;;  %v495_v54 = vadd.s32 80, %v1164_v2 }
  0xb5   : > { %817 = vmatmul.msk.f32.gmra.mxu2 %vm347_vm1, %v797_v52  ;;  %v494_v52 = vadd.s32 72, %v1164_v2 }
  0xb8   : > { %v275_v56 = vpop.permute.xlu1 %274 }
  0xb9   : > { %vm302_vm3 = vcmp.eq.s32.totalorder %v275_v56, %v1102_v25  ;;  %v260_v57 = vpop.permute.xlu0 %259 }
  0xba   : > { %v798_v59 = vsel %vm302_vm3, 1.0, %v992_v28  ;;  %vm297_vm4 = vcmp.eq.s32.totalorder %v260_v57, %v1102_v25  ;;  %v513_v57 = vadd.s32 %v1180_v8, %v493_v44  ;;  %v519_v44 = vadd.s32 %v1180_v8, %v499_v30 }
  0xbb   : > { %v793_v60 = vsel %vm297_vm4, 1.0, %v992_v28  ;;  %821 = vmatmul.msk.f32.gmra.mxu3 %vm347_vm1, %v801_v58  ;;  %v551_v58 = vld [vmem:[%s1178_s17 + $0x40] sm:$0xff] }
  0xbc   : > { %813 = vmatmul.msk.f32.gmra.mxu1 %vm347_vm1, %v793_v60  ;;  %vm532_vm13 = vcmp.lt.s32.totalorder %v513_v57, 300  ;;  %v559_v57 = vld [vmem:[%s1178_s17 + $0x80] sm:$0xff]  ;;  %vm538_vm4 = vcmp.lt.s32.totalorder %v519_v44, 300 }
  0xbd   : > { %818 = vmatmul.msk.f32.gmra.mxu2 %vm347_vm1, %v798_v59 }
  0xc1   : > { %v287_v61 = vpop.permute.xlu0 %286 }
  0xc2   : > { %vm306_vm5 = vcmp.eq.s32.totalorder %v287_v61, %v1102_v25  ;;  %v489_v25 = vadd.s32 32, %v1164_v2  ;;  %v496_v61 = vadd.s32 88, %v1164_v2 }
  0xc3   : > { %v802_v62 = vsel %vm306_vm5, 1.0, %v992_v28  ;;  %v491_v28 = vadd.s32 48, %v1164_v2 }
  0xc4   : > { %822 = vmatmul.msk.f32.gmra.mxu3 %vm347_vm1, %v802_v62  ;;  %vm525_vm1 = vcmp.lt.s32.totalorder %v506_v9, 300  ;;  %v509_v35 = vadd.s32 %v1180_v8, %v489_v25 }
  0xc5   : > { %v511_v39 = vadd.s32 %v1180_v8, %v491_v28  ;;  %v555_v28 = vld [vmem:[%s1178_s17 + $0x60] sm:$0xff] }
  0xc6   : > { %vm528_vm10 = vcmp.lt.s32.totalorder %v509_v35, 300 }
  0xc7   : > { %vm530_vm11 = vcmp.lt.s32.totalorder %v511_v39, 300 }
 0x110   : > { %v1161_v0 = vpop.f32.mrf.mxu1 }
 0x111   : > { %v426_v63 = vpop.f32.mrf.mxu0  ;;  %v567_v45 = vsub.f32 %v548_v33, %v1161_v0 }
 0x112   : > { %v562_v20 = vsub.f32 %v543_v13, %v426_v63  ;;  %v552_v13 = vld [vmem:[%s1178_s17 + $0x48] sm:$0xff] }
 0x113   : > { %v624_v59 = vsel %vm529_vm9, %v567_v45, 0.0  ;;  %v557_v45 = vld [vmem:[%s1178_s17 + $0x70] sm:$0xff] }
 0x114   : > { %v619_v29 = vsel %vm524_vm6, %v562_v20, 0.0  ;;  %v643_v9 = vmul.f32 %v624_v59, %v624_v59  ;;  %v503_v59 = vadd.s32 144, %v1164_v2 }
 0x115   : > { %v638_v38 = vmul.f32 %v619_v29, %v619_v29 }
 0x118   : > { %v1170_v5 = vpop.f32.mrf.mxu1 }
 0x119   : > { %v429_v1 = vpop.f32.mrf.mxu0  ;;  %v568_v53 = vsub.f32 %v549_v40, %v1170_v5  ;;  %v515_v5 = vadd.s32 %v1180_v8, %v495_v54  ;;  %v501_v40 = vadd.s32 128, %v1164_v2 }
 0x11a   : > { %v563_v16 = vsub.f32 %v544_v10, %v429_v1  ;;  %v514_v1 = vadd.s32 %v1180_v8, %v494_v52  ;;  %v553_v10 = vld [vmem:[%s1178_s17 + $0x50] sm:$0xff] }
 0x11b   : > { %v625_v4 = vsel %vm530_vm11, %v568_v53, 0.0  ;;  %vm534_vm15 = vcmp.lt.s32.totalorder %v515_v5, 300  ;;  %v521_v54 = vadd.s32 %v1180_v8, %v501_v40 }
 0x11c   : > { %v620_v26 = vsel %vm525_vm1, %v563_v16, 0.0  ;;  %v644_v18 = vmul.f32 %v625_v4, %v625_v4  ;;  %vm533_vm14 = vcmp.lt.s32.totalorder %v514_v1, 300  ;;  %v560_v1 = vld [vmem:[%s1178_s17 + $0x88] sm:$0xff] }
 0x11d   : > { %v639_v34 = vmul.f32 %v620_v26, %v620_v26  ;;  %vm540_vm1 = vcmp.lt.s32.totalorder %v521_v54, 300 }
 0x11e   : > { %v1167_v3 = vpop.f32.mrf.mxu2 }
 0x11f   : > { %v657_v47 = vadd.f32 %v639_v34, %v638_v38 }
 0x120   : > { %v447_v23 = vpop.f32.mrf.mxu1 }
 0x121   : > { %v432_v6 = vpop.f32.mrf.mxu0  ;;  %v569_v60 = vsub.f32 %v550_v48, %v447_v23  ;;  %v572_v23 = vsub.f32 %v553_v10, %v1167_v3  ;;  %v518_v3 = vadd.s32 %v1180_v8, %v498_v21 }
 0x122   : > { %v564_v22 = vsub.f32 %v545_v15, %v432_v6  ;;  %v516_v15 = vadd.s32 %v1180_v8, %v496_v61 }
 0x123   : > { %v626_v14 = vsel %vm531_vm12, %v569_v60, 0.0  ;;  %v629_v38 = vsel %vm534_vm15, %v572_v23, 0.0  ;;  %vm537_vm3 = vcmp.lt.s32.totalorder %v518_v3, 300 }
 0x124   : > { %v621_v31 = vsel %vm526_vm7, %v564_v22, 0.0  ;;  %v645_v26 = vmul.f32 %v626_v14, %v626_v14  ;;  %vm535_vm0 = vcmp.lt.s32.totalorder %v516_v15, 300 }
 0x125   : > { %v640_v41 = vmul.f32 %v621_v31, %v621_v31 }
 0x127   : > { %v1190_v17 = vpop.f32.mrf.mxu2  ;;  %v658_v56 = vadd.f32 %v657_v47, %v640_v41  ;;  %v520_v47 = vadd.s32 %v1180_v8, %v500_v32 }
 0x129   : > { %v435_v24 = vpop.f32.mrf.mxu0  ;;  %vm539_vm5 = vcmp.lt.s32.totalorder %v520_v47, 300 }
 0x12a   : > { %v565_v27 = vsub.f32 %v546_v19, %v435_v24  ;;  %v554_v19 = vld [vmem:[%s1178_s17 + $0x58] sm:$0xff] }
 0x12b   : > { %v573_v31 = vsub.f32 %v554_v19, %v1190_v17 }
 0x12c   : > { %v622_v36 = vsel %vm527_vm8, %v565_v27, 0.0  ;;  %v517_v27 = vadd.s32 %v1180_v8, %v497_v11  ;;  %v561_v11 = vld [vmem:[%s1178_s17 + $0x90] sm:$0xff] }
 0x12d   : > { %v641_v49 = vmul.f32 %v622_v36, %v622_v36  ;;  %v556_v36 = vld [vmem:[%s1178_s17 + $0x68] sm:$0xff]  ;;  %v630_v46 = vsel %vm535_vm0, %v573_v31, 0.0 }
 0x12e   : > { %v1201_v37 = vpop.f32.mrf.mxu3  ;;  %vm536_vm2 = vcmp.lt.s32.totalorder %v517_v27, 300 }
 0x12f   : > { %v1205_v42 = vpop.f32.mrf.mxu2  ;;  %v659_v63 = vadd.f32 %v658_v56, %v641_v49  ;;  %v649_v56 = vmul.f32 %v630_v46, %v630_v46 }
 0x130   : > { %v574_v39 = vsub.f32 %v555_v28, %v1205_v42  ;;  %v502_v42 = vadd.s32 136, %v1164_v2  ;;  %v523_v2 = vadd.s32 %v1180_v8, %v503_v59 }
 0x131   : > { %v438_v50 = vpop.f32.mrf.mxu0  ;;  %v450_v51 = vpop.f32.mrf.mxu1 }
 0x132   : > { %v566_v55 = vsub.f32 %v547_v43, %v438_v50  ;;  %v570_v6 = vsub.f32 %v551_v58, %v450_v51  ;;  %v648_v50 = vmul.f32 %v629_v38, %v629_v38  ;;  %v558_v51 = vld [vmem:[%s1178_s17 + $0x78] sm:$0xff]  ;;  %v631_v53 = vsel %vm536_vm2, %v574_v39, 0.0 }
 0x133   : > { %v577_v60 = vsub.f32 %v558_v51, %v1201_v37  ;;  %vm542_vm7 = vcmp.lt.s32.totalorder %v523_v2, 300 }
 0x134   : > { %v623_v62 = vsel %vm528_vm10, %v566_v55, 0.0  ;;  %v627_v24 = vsel %vm532_vm13, %v570_v6, 0.0 }
 0x135   : > { %v642_v0 = vmul.f32 %v623_v62, %v623_v62  ;;  %v646_v34 = vmul.f32 %v627_v24, %v627_v24  ;;  %v650_v62 = vmul.f32 %v631_v53, %v631_v53  ;;  %v634_v37 = vsel %vm539_vm5, %v577_v60, 0.0 }
 0x136   : > { %v1221_v7 = vpop.f32.mrf.mxu3 }
 0x137   : > { %v660_v12 = vadd.f32 %v659_v63, %v642_v0  ;;  %v522_v0 = vadd.s32 %v1180_v8, %v502_v42  ;;  %v578_v4 = vsub.f32 %v559_v57, %v1221_v7  ;;  %v653_v7 = vmul.f32 %v634_v37, %v634_v37 }
 0x138   : > { %v465_v16 = vpop.f32.mrf.mxu2 }
 0x139   : > { %v661_v20 = vadd.f32 %v660_v12, %v643_v9  ;;  %v453_v22 = vpop.f32.mrf.mxu1  ;;  %v575_v48 = vsub.f32 %v556_v36, %v465_v16  ;;  %vm541_vm6 = vcmp.lt.s32.totalorder %v522_v0, 300  ;;  %v635_v15 = vsel %vm540_vm1, %v578_v4, 0.0 }
 0x13a   : > { %v571_v25 = vsub.f32 %v552_v13, %v453_v22 }
 0x13b   : > { %v662_v29 = vadd.f32 %v661_v20, %v644_v18  ;;  %v632_v61 = vsel %vm537_vm3, %v575_v48, 0.0  ;;  %v654_v20 = vmul.f32 %v635_v15, %v635_v15 }
 0x13c   : > { %v628_v33 = vsel %vm533_vm14, %v571_v25, 0.0  ;;  %v651_v6 = vmul.f32 %v632_v61, %v632_v61 }
 0x13d   : > { %v663_v35 = vadd.f32 %v662_v29, %v645_v26  ;;  %v647_v43 = vmul.f32 %v628_v33, %v628_v33 }
 0x13e   : > { %v477_v41 = vpop.f32.mrf.mxu3 }
 0x13f   : > { %v664_v17 = vadd.f32 %v663_v35, %v646_v34  ;;  %v579_v12 = vsub.f32 %v560_v1, %v477_v41 }
 0x140   : > { %v468_v49 = vpop.f32.mrf.mxu2 }
 0x141   : > { %v665_v52 = vadd.f32 %v664_v17, %v647_v43  ;;  %v576_v55 = vsub.f32 %v557_v45, %v468_v49  ;;  %v636_v19 = vsel %vm541_vm6, %v579_v12, 0.0 }
 0x142   : > { %v655_v22 = vmul.f32 %v636_v19, %v636_v19 }
 0x143   : > { %v666_v58 = vadd.f32 %v665_v52, %v648_v50  ;;  %v633_v5 = vsel %vm538_vm4, %v576_v55, 0.0 }
 0x144   : > { %v652_v13 = vmul.f32 %v633_v5, %v633_v5 }
 0x145   : > { %v667_v63 = vadd.f32 %v666_v58, %v649_v56 }
 0x147   : > { %v668_v9 = vadd.f32 %v667_v63, %v650_v62  ;;  %v480_v10 = vpop.f32.mrf.mxu3 }
 0x148   : > { %v580_v16 = vsub.f32 %v561_v11, %v480_v10 }
 0x149   : > { %v669_v14 = vadd.f32 %v668_v9, %v651_v6 }
 0x14a   : > { %v637_v8 = vsel %vm542_vm7, %v580_v16, 0.0 }
 0x14b   : > { %v670_v18 = vadd.f32 %v669_v14, %v652_v13  ;;  %v656_v25 = vmul.f32 %v637_v8, %v637_v8 }
 0x14d   : > { %v671_v21 = vadd.f32 %v670_v18, %v653_v7 }
 0x14f   : > { %v672_v23 = vadd.f32 %v671_v21, %v654_v20 }
 0x151   : > { %v673_v24 = vadd.f32 %v672_v23, %v655_v22 }
 0x153   : > { %v674_v26 = vadd.f32 %v673_v24, %v656_v25 }
 0x155   : > { %675 = vst [vmem:[%s197_s28] sm:$0xff] %v674_v26 }
 0x156   : > { %947 = shalt.err (!%p944_p8)
}
 0x157   : > { %837 = dma.vmem_to_hbm [thread:$0]  (%p1051_p5), %s690_s29, 128, %s692_s30, %s677_s16  }
 0x158 PF: > { %p849_p9 = scmp.ge.s32.totalorder %s986_s15, 2  ;;  %s703_s11 = sand.u32 1, %s974_s12  }
 0x159   : > { %s704_s17 = scalar_lea.sflag [#allocation4], %s703_s11 }
 0x15a   : > { %p844_p10 = pnand %p849_p9, %p1055_p6 }
 0x15c   : > { %p845_p11 = pneg %p844_p10 }
 0x15e   : > { %969 = dma.done.wait (%p845_p11), %s704_s17, 128  }
 0x15f   : > { %971 = vsyncadd (%p845_p11), %s704_s17, 4294967168  ;;  %p14_p12 = scmp.ge.s32.totalorder %s1038_s18, 4   ;;  %s1292_s12 = smov %s978_s13 }
 0x160   : > { %s1293_s13 = smov %s982_s14  ;;  %s1294_s14 = smov %s1049_s21 }
 0x161   : > { %s1295_s15 = smov %s1038_s18  ;;  %16 = sbr.rel (!%p14_p12) target bundleno = 4 (0x4), region = 75 }
 0x166   :  { %710 = vsyncpa [#allocation3], 1 }
 0x167   :  { %712 = vsyncpa [#allocation3 + $0x1], 1 }
 0x168   :  { %713 = vsyncpa [#allocation4], 1 }
 0x169   :  { %715 = vsyncpa [#allocation4 + $0x1], 1 }

</bundles_post_ra>
